<compile_context>
chip_gen: v7x
topology: tpu7x:2x2x1
jax: 0.10.0
libtpu: 0.0.40
codegen_flags: <defaults>
</compile_context>

<pallas_src>
import functools

import jax
import jax.numpy as jnp
from jax import lax
from jax.experimental import pallas as pl
from jax.experimental.pallas import tpu as pltpu


def _round_up(x, m):
    return ((x + m - 1) // m) * m


def _sepconv_kernel(x_cur_ref, x_halo_ref, w_ref, o_ref, acc_ref, *,
                    kh, kw, th, wo_pad):
    """One (batch, row-tile) grid step.

    x_cur_ref : (th,     W_pad, C)   current TH input rows (NHWC, padded)
    x_halo_ref: (kh - 1, W_pad, C)   halo rows immediately below the tile
    w_ref     : (kh*kw, C, P_pad)    folded depthwise*pointwise weights (f32)
    o_ref     : (th*wo_pad, P_pad)   lane-dense output tile
    acc_ref   : (th*wo_pad, P_pad)   f32 VMEM accumulator
    """
    # Assemble the halo'd input window once; hoist the f32 cast out of the
    # tap loop (single cast pass instead of kh*kw of them).
    x_full = jnp.concatenate([x_cur_ref[...], x_halo_ref[...]], axis=0)
    xf = x_full.astype(jnp.float32)                      # (th+kh-1, W_pad, C)
    c = xf.shape[-1]

    # Depthwise folded into pointwise: one MXU matmul per tap, accumulated
    # into a f32 VMEM scratch (bounds vreg pressure vs. a 9-tap live sum).
    # wo_pad is a multiple of 8, so the (th, wo_pad, C) -> (th*wo_pad, C)
    # reshape is sublane-tile clean (no relayout copy).
    for t in range(kh * kw):
        i, j = divmod(t, kw)
        win = xf[i:i + th, j:j + wo_pad, :].reshape(th * wo_pad, c)
        contrib = jnp.dot(win, w_ref[t], preferred_element_type=jnp.float32)
        if t == 0:
            acc_ref[...] = contrib
        else:
            acc_ref[...] += contrib

    o_ref[...] = acc_ref[...].astype(o_ref.dtype)


def separable_conv2d(x_nchw, w_depthwise, w_pointwise, *, kernel_size=3,
                     row_tile=8):
    """Forward pass of SeparableConv2d (stride=1, padding=0, dilation=1, bias=False).

    x_nchw      : (N, C, H, W)
    w_depthwise : (C, 1, K, K)   PyTorch depthwise conv weight
    w_pointwise : (P, C, 1, 1)   PyTorch pointwise conv weight
    returns     : (N, P, Ho, Wo) with Ho = H-K+1, Wo = W-K+1
    """
    N, C, H, W = x_nchw.shape
    K = kernel_size
    P = w_pointwise.shape[0]
    Ho, Wo = H - K + 1, W - K + 1
    assert K >= 2 and Ho > 0 and Wo > 0

    TH = row_tile                      # output rows per grid step
    assert TH % 8 == 0
    assert TH % (K - 1) == 0, "row tile must be a multiple of K-1 (halo spec)"

    Wo_pad = _round_up(Wo, 8)          # sublane-clean flattening
    Ho_pad = _round_up(Ho, TH)
    H_pad = Ho_pad + K - 1
    W_pad = Wo_pad + K - 1
    P_pad = _round_up(P, 128)          # lane-dense output / MXU N dim
    n_row_tiles = Ho_pad // TH

    # ---- layout / weight-folding glue (plain JAX) --------------------------
    x_nhwc = jnp.transpose(x_nchw, (0, 2, 3, 1))                     # (N,H,W,C)
    x_pad = jnp.pad(x_nhwc, ((0, 0), (0, H_pad - H), (0, W_pad - W), (0, 0)))

    # w_comb[i*K+j, c, p] = w_dw[c, i, j] * w_pw[p, c]
    wdw = w_depthwise[:, 0, :, :].astype(jnp.float32)                # (C,K,K)
    wpw = w_pointwise[:, :, 0, 0].astype(jnp.float32)                # (P,C)
    w_comb = jnp.einsum('ckl,pc->klcp', wdw, wpw).reshape(K * K, C, P)
    w_comb = jnp.pad(w_comb, ((0, 0), (0, 0), (0, P_pad - P)))       # (K*K,C,P_pad)

    kernel = functools.partial(_sepconv_kernel, kh=K, kw=K, th=TH, wo_pad=Wo_pad)

    # VMEM budget from the chosen block sizes (double-buffered) + scratch.
    in_item = x_pad.dtype.itemsize
    out_item = jnp.dtype(x_nchw.dtype).itemsize
    blk_bytes = (TH * W_pad * C * in_item                 # current row tile
                 + (K - 1) * W_pad * C * in_item          # halo rows
                 + K * K * C * P_pad * 4                  # folded weights
                 + TH * Wo_pad * P_pad * out_item)        # output tile
    vmem_limit = int(max(4 * (2 * blk_bytes + TH * Wo_pad * P_pad * 4),
                         8 * 1024 * 1024))

    out_flat = pl.pallas_call(
        kernel,
        out_shape=jax.ShapeDtypeStruct((N, Ho_pad * Wo_pad, P_pad), x_nchw.dtype),
        grid_spec=pltpu.PrefetchScalarGridSpec(
            num_scalar_prefetch=0,
            grid=(N, n_row_tiles),
            in_specs=[
                # current TH-row slab of the padded image (batch dim squeezed)
                pl.BlockSpec((None, TH, W_pad, C),
                             lambda n, r: (n, r, 0, 0)),
                # (K-1)-row halo just below the slab: same array, second view
                pl.BlockSpec((None, K - 1, W_pad, C),
                             lambda n, r: (n, (r + 1) * (TH // (K - 1)), 0, 0)),
                # folded weights, full block, resident across the grid
                pl.BlockSpec((K * K, C, P_pad), lambda n, r: (0, 0, 0)),
            ],
            out_specs=pl.BlockSpec((None, TH * Wo_pad, P_pad),
                                   lambda n, r: (n, r, 0)),
            scratch_shapes=[pltpu.VMEM((TH * Wo_pad, P_pad), jnp.float32)],
        ),
        compiler_params=pltpu.CompilerParams(
            dimension_semantics=("parallel", "parallel"),
            vmem_limit_bytes=vmem_limit),
    )(x_pad, x_pad, w_comb)

    # Strip spatial/channel padding and return NCHW (plain XLA glue).
    out = out_flat.reshape(N, Ho_pad, Wo_pad, P_pad)[:, :Ho, :Wo, :P]
    return jnp.transpose(out, (0, 3, 1, 2))


def _reference(x_nchw, w_depthwise, w_pointwise):
    C = x_nchw.shape[1]
    dn = lax.conv_dimension_numbers(x_nchw.shape, w_depthwise.shape,
                                    ("NCHW", "OIHW", "NCHW"))
    y = lax.conv_general_dilated(x_nchw, w_depthwise, window_strides=(1, 1),
                                 padding="VALID", dimension_numbers=dn,
                                 feature_group_count=C)
    dn2 = lax.conv_dimension_numbers(y.shape, w_pointwise.shape,
                                     ("NCHW", "OIHW", "NCHW"))
    return lax.conv_general_dilated(y, w_pointwise, window_strides=(1, 1),
                                    padding="VALID", dimension_numbers=dn2)


if __name__ == "__main__":
    key = jax.random.PRNGKey(0)
    k_x, k_dw, k_pw = jax.random.split(key, 3)

    N, C, H, W = 2, 4, 16, 16     # inplanes = 4
    P, K = 8, 3                   # planes = 8, kernel_size = 3

    x = jax.random.normal(k_x, (N, C, H, W), dtype=jnp.float32)
    # PyTorch Conv2d weight shapes: depthwise (C, 1, K, K), pointwise (P, C, 1, 1)
    w_dw = jax.random.normal(k_dw, (C, 1, K, K), dtype=jnp.float32) * 0.1
    w_pw = jax.random.normal(k_pw, (P, C, 1, 1), dtype=jnp.float32) * 0.1

    out = separable_conv2d(x, w_dw, w_pw, kernel_size=K)
    out = jax.block_until_ready(out)

    ref = _reference(x, w_dw, w_pw)
    assert out.shape == ref.shape, (out.shape, ref.shape)
    assert jnp.allclose(out, ref, atol=1e-4, rtol=1e-4), "mismatch vs reference"

    print("KERNEL_OK")
</pallas_src>

<mosaic_0001>
module attributes {stable_mosaic.version = 11 : i64} {
  func.func @_sepconv_kernel(%arg0: i32, %arg1: i32, %arg2: memref<1x8x18x4xf32, #tpu.memory_space<vmem>>, %arg3: memref<1x2x18x4xf32, #tpu.memory_space<vmem>>, %arg4: memref<9x4x128xf32, #tpu.memory_space<vmem>>, %arg5: memref<1x128x128xf32, #tpu.memory_space<vmem>>, %arg6: memref<128x128xf32, #tpu.memory_space<vmem>>) attributes {dimension_semantics = [#tpu.dimension_semantics<parallel>, #tpu.dimension_semantics<parallel>], iteration_bounds = array<i64: 2, 2>, scalar_prefetch = 0 : i64, scratch_operands = 1 : i64, tpu.core_type = #tpu.core_type<tc>, window_params = [{transform_indices = @transform_0, window_bounds = array<i64: 1, 8, 18, 4>}, {transform_indices = @transform_1, window_bounds = array<i64: 1, 2, 18, 4>}, {pipeline_mode = #tpu.pipeline_mode<synchronous>, transform_indices = @transform_2, window_bounds = array<i64: 9, 4, 128>}, {transform_indices = @transform_3, window_bounds = array<i64: 1, 128, 128>}]} {
    %c0 = arith.constant 0 : index
    %c0_0 = arith.constant 0 : index
    %c0_1 = arith.constant 0 : index
    %c0_2 = arith.constant 0 : index
    %0 = vector.load %arg2[%c0, %c0_0, %c0_1, %c0_2] : memref<1x8x18x4xf32, #tpu.memory_space<vmem>>, vector<1x8x18x4xf32>
    %1 = vector.shape_cast %0 : vector<1x8x18x4xf32> to vector<8x18x4xf32>
    %c0_3 = arith.constant 0 : index
    %c0_4 = arith.constant 0 : index
    %c0_5 = arith.constant 0 : index
    %c0_6 = arith.constant 0 : index
    %2 = vector.load %arg3[%c0_3, %c0_4, %c0_5, %c0_6] : memref<1x2x18x4xf32, #tpu.memory_space<vmem>>, vector<1x2x18x4xf32>
    %3 = vector.shape_cast %2 : vector<1x2x18x4xf32> to vector<2x18x4xf32>
    %4 = tpu.concatenate %1, %3 in 0 : vector<8x18x4xf32>, vector<2x18x4xf32> -> vector<10x18x4xf32>
    %5 = vector.extract_strided_slice %4 {offsets = [0, 0, 0], sizes = [8, 16, 4], strides = [1, 1, 1]} : vector<10x18x4xf32> to vector<8x16x4xf32>
    %6 = vector.shape_cast %5 : vector<8x16x4xf32> to vector<128x4xf32>
    %c0_7 = arith.constant 0 : index
    %c0_8 = arith.constant 0 : index
    %c0_9 = arith.constant 0 : index
    %7 = vector.load %arg4[%c0_7, %c0_8, %c0_9] : memref<9x4x128xf32, #tpu.memory_space<vmem>>, vector<1x4x128xf32>
    %8 = vector.shape_cast %7 : vector<1x4x128xf32> to vector<4x128xf32>
    %cst = arith.constant dense<0.000000e+00> : vector<128x128xf32>
    %9 = tpu.matmul %6, %8, %cst {dimension_numbers = #tpu.dot_dimension_numbers<[1], [0], [0], [1], [0, 0, 1, 1], [], []>} : vector<128x4xf32>, vector<4x128xf32>, vector<128x128xf32> -> vector<128x128xf32>
    %c0_10 = arith.constant 0 : index
    %c0_11 = arith.constant 0 : index
    %10 = vector.load %arg6[%c0_10, %c0_11] : memref<128x128xf32, #tpu.memory_space<vmem>>, vector<128x128xf32>
    tpu.vector_store %arg6[%c0_10, %c0_11], %9 {strides = array<i32>} : memref<128x128xf32, #tpu.memory_space<vmem>>, vector<128x128xf32>,
    %11 = vector.extract_strided_slice %4 {offsets = [0, 1, 0], sizes = [8, 16, 4], strides = [1, 1, 1]} : vector<10x18x4xf32> to vector<8x16x4xf32>
    %12 = vector.shape_cast %11 : vector<8x16x4xf32> to vector<128x4xf32>
    %c1 = arith.constant 1 : index
    %c0_12 = arith.constant 0 : index
    %c0_13 = arith.constant 0 : index
    %13 = vector.load %arg4[%c1, %c0_12, %c0_13] : memref<9x4x128xf32, #tpu.memory_space<vmem>>, vector<1x4x128xf32>
    %14 = vector.shape_cast %13 : vector<1x4x128xf32> to vector<4x128xf32>
    %cst_14 = arith.constant dense<0.000000e+00> : vector<128x128xf32>
    %15 = tpu.matmul %12, %14, %cst_14 {dimension_numbers = #tpu.dot_dimension_numbers<[1], [0], [0], [1], [0, 0, 1, 1], [], []>} : vector<128x4xf32>, vector<4x128xf32>, vector<128x128xf32> -> vector<128x128xf32>
    %c0_15 = arith.constant 0 : index
    %c0_16 = arith.constant 0 : index
    %16 = vector.load %arg6[%c0_15, %c0_16] : memref<128x128xf32, #tpu.memory_space<vmem>>, vector<128x128xf32>
    %17 = arith.addf %16, %15 : vector<128x128xf32>
    %c0_17 = arith.constant 0 : index
    %c0_18 = arith.constant 0 : index
    %18 = vector.load %arg6[%c0_17, %c0_18] : memref<128x128xf32, #tpu.memory_space<vmem>>, vector<128x128xf32>
    tpu.vector_store %arg6[%c0_17, %c0_18], %17 {strides = array<i32>} : memref<128x128xf32, #tpu.memory_space<vmem>>, vector<128x128xf32>,
    %19 = vector.extract_strided_slice %4 {offsets = [0, 2, 0], sizes = [8, 16, 4], strides = [1, 1, 1]} : vector<10x18x4xf32> to vector<8x16x4xf32>
    %20 = vector.shape_cast %19 : vector<8x16x4xf32> to vector<128x4xf32>
    %c2 = arith.constant 2 : index
    %c0_19 = arith.constant 0 : index
    %c0_20 = arith.constant 0 : index
    %21 = vector.load %arg4[%c2, %c0_19, %c0_20] : memref<9x4x128xf32, #tpu.memory_space<vmem>>, vector<1x4x128xf32>
    %22 = vector.shape_cast %21 : vector<1x4x128xf32> to vector<4x128xf32>
    %cst_21 = arith.constant dense<0.000000e+00> : vector<128x128xf32>
    %23 = tpu.matmul %20, %22, %cst_21 {dimension_numbers = #tpu.dot_dimension_numbers<[1], [0], [0], [1], [0, 0, 1, 1], [], []>} : vector<128x4xf32>, vector<4x128xf32>, vector<128x128xf32> -> vector<128x128xf32>
    %c0_22 = arith.constant 0 : index
    %c0_23 = arith.constant 0 : index
    %24 = vector.load %arg6[%c0_22, %c0_23] : memref<128x128xf32, #tpu.memory_space<vmem>>, vector<128x128xf32>
    %25 = arith.addf %24, %23 : vector<128x128xf32>
    %c0_24 = arith.constant 0 : index
    %c0_25 = arith.constant 0 : index
    %26 = vector.load %arg6[%c0_24, %c0_25] : memref<128x128xf32, #tpu.memory_space<vmem>>, vector<128x128xf32>
    tpu.vector_store %arg6[%c0_24, %c0_25], %25 {strides = array<i32>} : memref<128x128xf32, #tpu.memory_space<vmem>>, vector<128x128xf32>,
    %27 = vector.extract_strided_slice %4 {offsets = [1, 0, 0], sizes = [8, 16, 4], strides = [1, 1, 1]} : vector<10x18x4xf32> to vector<8x16x4xf32>
    %28 = vector.shape_cast %27 : vector<8x16x4xf32> to vector<128x4xf32>
    %c3 = arith.constant 3 : index
    %c0_26 = arith.constant 0 : index
    %c0_27 = arith.constant 0 : index
    %29 = vector.load %arg4[%c3, %c0_26, %c0_27] : memref<9x4x128xf32, #tpu.memory_space<vmem>>, vector<1x4x128xf32>
    %30 = vector.shape_cast %29 : vector<1x4x128xf32> to vector<4x128xf32>
    %cst_28 = arith.constant dense<0.000000e+00> : vector<128x128xf32>
    %31 = tpu.matmul %28, %30, %cst_28 {dimension_numbers = #tpu.dot_dimension_numbers<[1], [0], [0], [1], [0, 0, 1, 1], [], []>} : vector<128x4xf32>, vector<4x128xf32>, vector<128x128xf32> -> vector<128x128xf32>
    %c0_29 = arith.constant 0 : index
    %c0_30 = arith.constant 0 : index
    %32 = vector.load %arg6[%c0_29, %c0_30] : memref<128x128xf32, #tpu.memory_space<vmem>>, vector<128x128xf32>
    %33 = arith.addf %32, %31 : vector<128x128xf32>
    %c0_31 = arith.constant 0 : index
    %c0_32 = arith.constant 0 : index
    %34 = vector.load %arg6[%c0_31, %c0_32] : memref<128x128xf32, #tpu.memory_space<vmem>>, vector<128x128xf32>
    tpu.vector_store %arg6[%c0_31, %c0_32], %33 {strides = array<i32>} : memref<128x128xf32, #tpu.memory_space<vmem>>, vector<128x128xf32>,
    %35 = vector.extract_strided_slice %4 {offsets = [1, 1, 0], sizes = [8, 16, 4], strides = [1, 1, 1]} : vector<10x18x4xf32> to vector<8x16x4xf32>
    %36 = vector.shape_cast %35 : vector<8x16x4xf32> to vector<128x4xf32>
    %c4 = arith.constant 4 : index
    %c0_33 = arith.constant 0 : index
    %c0_34 = arith.constant 0 : index
    %37 = vector.load %arg4[%c4, %c0_33, %c0_34] : memref<9x4x128xf32, #tpu.memory_space<vmem>>, vector<1x4x128xf32>
    %38 = vector.shape_cast %37 : vector<1x4x128xf32> to vector<4x128xf32>
    %cst_35 = arith.constant dense<0.000000e+00> : vector<128x128xf32>
    %39 = tpu.matmul %36, %38, %cst_35 {dimension_numbers = #tpu.dot_dimension_numbers<[1], [0], [0], [1], [0, 0, 1, 1], [], []>} : vector<128x4xf32>, vector<4x128xf32>, vector<128x128xf32> -> vector<128x128xf32>
    %c0_36 = arith.constant 0 : index
    %c0_37 = arith.constant 0 : index
    %40 = vector.load %arg6[%c0_36, %c0_37] : memref<128x128xf32, #tpu.memory_space<vmem>>, vector<128x128xf32>
    %41 = arith.addf %40, %39 : vector<128x128xf32>
    %c0_38 = arith.constant 0 : index
    %c0_39 = arith.constant 0 : index
    %42 = vector.load %arg6[%c0_38, %c0_39] : memref<128x128xf32, #tpu.memory_space<vmem>>, vector<128x128xf32>
    tpu.vector_store %arg6[%c0_38, %c0_39], %41 {strides = array<i32>} : memref<128x128xf32, #tpu.memory_space<vmem>>, vector<128x128xf32>,
    %43 = vector.extract_strided_slice %4 {offsets = [1, 2, 0], sizes = [8, 16, 4], strides = [1, 1, 1]} : vector<10x18x4xf32> to vector<8x16x4xf32>
    %44 = vector.shape_cast %43 : vector<8x16x4xf32> to vector<128x4xf32>
    %c5 = arith.constant 5 : index
    %c0_40 = arith.constant 0 : index
    %c0_41 = arith.constant 0 : index
    %45 = vector.load %arg4[%c5, %c0_40, %c0_41] : memref<9x4x128xf32, #tpu.memory_space<vmem>>, vector<1x4x128xf32>
    %46 = vector.shape_cast %45 : vector<1x4x128xf32> to vector<4x128xf32>
    %cst_42 = arith.constant dense<0.000000e+00> : vector<128x128xf32>
    %47 = tpu.matmul %44, %46, %cst_42 {dimension_numbers = #tpu.dot_dimension_numbers<[1], [0], [0], [1], [0, 0, 1, 1], [], []>} : vector<128x4xf32>, vector<4x128xf32>, vector<128x128xf32> -> vector<128x128xf32>
    %c0_43 = arith.constant 0 : index
    %c0_44 = arith.constant 0 : index
    %48 = vector.load %arg6[%c0_43, %c0_44] : memref<128x128xf32, #tpu.memory_space<vmem>>, vector<128x128xf32>
    %49 = arith.addf %48, %47 : vector<128x128xf32>
    %c0_45 = arith.constant 0 : index
    %c0_46 = arith.constant 0 : index
    %50 = vector.load %arg6[%c0_45, %c0_46] : memref<128x128xf32, #tpu.memory_space<vmem>>, vector<128x128xf32>
    tpu.vector_store %arg6[%c0_45, %c0_46], %49 {strides = array<i32>} : memref<128x128xf32, #tpu.memory_space<vmem>>, vector<128x128xf32>,
    %51 = vector.extract_strided_slice %4 {offsets = [2, 0, 0], sizes = [8, 16, 4], strides = [1, 1, 1]} : vector<10x18x4xf32> to vector<8x16x4xf32>
    %52 = vector.shape_cast %51 : vector<8x16x4xf32> to vector<128x4xf32>
    %c6 = arith.constant 6 : index
    %c0_47 = arith.constant 0 : index
    %c0_48 = arith.constant 0 : index
    %53 = vector.load %arg4[%c6, %c0_47, %c0_48] : memref<9x4x128xf32, #tpu.memory_space<vmem>>, vector<1x4x128xf32>
    %54 = vector.shape_cast %53 : vector<1x4x128xf32> to vector<4x128xf32>
    %cst_49 = arith.constant dense<0.000000e+00> : vector<128x128xf32>
    %55 = tpu.matmul %52, %54, %cst_49 {dimension_numbers = #tpu.dot_dimension_numbers<[1], [0], [0], [1], [0, 0, 1, 1], [], []>} : vector<128x4xf32>, vector<4x128xf32>, vector<128x128xf32> -> vector<128x128xf32>
    %c0_50 = arith.constant 0 : index
    %c0_51 = arith.constant 0 : index
    %56 = vector.load %arg6[%c0_50, %c0_51] : memref<128x128xf32, #tpu.memory_space<vmem>>, vector<128x128xf32>
    %57 = arith.addf %56, %55 : vector<128x128xf32>
    %c0_52 = arith.constant 0 : index
    %c0_53 = arith.constant 0 : index
    %58 = vector.load %arg6[%c0_52, %c0_53] : memref<128x128xf32, #tpu.memory_space<vmem>>, vector<128x128xf32>
    tpu.vector_store %arg6[%c0_52, %c0_53], %57 {strides = array<i32>} : memref<128x128xf32, #tpu.memory_space<vmem>>, vector<128x128xf32>,
    %59 = vector.extract_strided_slice %4 {offsets = [2, 1, 0], sizes = [8, 16, 4], strides = [1, 1, 1]} : vector<10x18x4xf32> to vector<8x16x4xf32>
    %60 = vector.shape_cast %59 : vector<8x16x4xf32> to vector<128x4xf32>
    %c7 = arith.constant 7 : index
    %c0_54 = arith.constant 0 : index
    %c0_55 = arith.constant 0 : index
    %61 = vector.load %arg4[%c7, %c0_54, %c0_55] : memref<9x4x128xf32, #tpu.memory_space<vmem>>, vector<1x4x128xf32>
    %62 = vector.shape_cast %61 : vector<1x4x128xf32> to vector<4x128xf32>
    %cst_56 = arith.constant dense<0.000000e+00> : vector<128x128xf32>
    %63 = tpu.matmul %60, %62, %cst_56 {dimension_numbers = #tpu.dot_dimension_numbers<[1], [0], [0], [1], [0, 0, 1, 1], [], []>} : vector<128x4xf32>, vector<4x128xf32>, vector<128x128xf32> -> vector<128x128xf32>
    %c0_57 = arith.constant 0 : index
    %c0_58 = arith.constant 0 : index
    %64 = vector.load %arg6[%c0_57, %c0_58] : memref<128x128xf32, #tpu.memory_space<vmem>>, vector<128x128xf32>
    %65 = arith.addf %64, %63 : vector<128x128xf32>
    %c0_59 = arith.constant 0 : index
    %c0_60 = arith.constant 0 : index
    %66 = vector.load %arg6[%c0_59, %c0_60] : memref<128x128xf32, #tpu.memory_space<vmem>>, vector<128x128xf32>
    tpu.vector_store %arg6[%c0_59, %c0_60], %65 {strides = array<i32>} : memref<128x128xf32, #tpu.memory_space<vmem>>, vector<128x128xf32>,
    %67 = vector.extract_strided_slice %4 {offsets = [2, 2, 0], sizes = [8, 16, 4], strides = [1, 1, 1]} : vector<10x18x4xf32> to vector<8x16x4xf32>
    %68 = vector.shape_cast %67 : vector<8x16x4xf32> to vector<128x4xf32>
    %c8 = arith.constant 8 : index
    %c0_61 = arith.constant 0 : index
    %c0_62 = arith.constant 0 : index
    %69 = vector.load %arg4[%c8, %c0_61, %c0_62] : memref<9x4x128xf32, #tpu.memory_space<vmem>>, vector<1x4x128xf32>
    %70 = vector.shape_cast %69 : vector<1x4x128xf32> to vector<4x128xf32>
    %cst_63 = arith.constant dense<0.000000e+00> : vector<128x128xf32>
    %71 = tpu.matmul %68, %70, %cst_63 {dimension_numbers = #tpu.dot_dimension_numbers<[1], [0], [0], [1], [0, 0, 1, 1], [], []>} : vector<128x4xf32>, vector<4x128xf32>, vector<128x128xf32> -> vector<128x128xf32>
    %c0_64 = arith.constant 0 : index
    %c0_65 = arith.constant 0 : index
    %72 = vector.load %arg6[%c0_64, %c0_65] : memref<128x128xf32, #tpu.memory_space<vmem>>, vector<128x128xf32>
    %73 = arith.addf %72, %71 : vector<128x128xf32>
    %c0_66 = arith.constant 0 : index
    %c0_67 = arith.constant 0 : index
    %74 = vector.load %arg6[%c0_66, %c0_67] : memref<128x128xf32, #tpu.memory_space<vmem>>, vector<128x128xf32>
    tpu.vector_store %arg6[%c0_66, %c0_67], %73 {strides = array<i32>} : memref<128x128xf32, #tpu.memory_space<vmem>>, vector<128x128xf32>,
    %c0_68 = arith.constant 0 : index
    %c0_69 = arith.constant 0 : index
    %75 = vector.load %arg6[%c0_68, %c0_69] : memref<128x128xf32, #tpu.memory_space<vmem>>, vector<128x128xf32>
    %c0_70 = arith.constant 0 : index
    %c0_71 = arith.constant 0 : index
    %c0_72 = arith.constant 0 : index
    %76 = vector.load %arg5[%c0_70, %c0_71, %c0_72] : memref<1x128x128xf32, #tpu.memory_space<vmem>>, vector<1x128x128xf32>
    %77 = vector.shape_cast %76 : vector<1x128x128xf32> to vector<128x128xf32>
    %78 = vector.shape_cast %75 : vector<128x128xf32> to vector<1x128x128xf32>
    tpu.vector_store %arg5[%c0_70, %c0_71, %c0_72], %78 {strides = array<i32>} : memref<1x128x128xf32, #tpu.memory_space<vmem>>, vector<1x128x128xf32>,
    return
  }
  func.func @transform_0(%arg0: i32, %arg1: i32) -> (i32, i32, i32, i32) {
    %c0_i32 = arith.constant 0 : i32
    %c0_i32_0 = arith.constant 0 : i32
    %c0_i32_1 = arith.constant 0 : i32
    return %arg0, %arg1, %c0_i32, %c0_i32_0 : i32, i32, i32, i32
  }
  func.func @transform_1(%arg0: i32, %arg1: i32) -> (i32, i32, i32, i32) {
    %c1_i32 = arith.constant 1 : i32
    %0 = arith.addi %arg1, %c1_i32 : i32
    %c4_i32 = arith.constant 4 : i32
    %1 = arith.muli %0, %c4_i32 : i32
    %c0_i32 = arith.constant 0 : i32
    %c0_i32_0 = arith.constant 0 : i32
    %c0_i32_1 = arith.constant 0 : i32
    return %arg0, %1, %c0_i32, %c0_i32_0 : i32, i32, i32, i32
  }
  func.func @transform_2(%arg0: i32, %arg1: i32) -> (i32, i32, i32) {
    %c0_i32 = arith.constant 0 : i32
    %c0_i32_0 = arith.constant 0 : i32
    %c0_i32_1 = arith.constant 0 : i32
    %c0_i32_2 = arith.constant 0 : i32
    return %c0_i32, %c0_i32_0, %c0_i32_1 : i32, i32, i32
  }
  func.func @transform_3(%arg0: i32, %arg1: i32) -> (i32, i32, i32) {
    %c0_i32 = arith.constant 0 : i32
    %c0_i32_0 = arith.constant 0 : i32
    return %arg0, %arg1, %c0_i32 : i32, i32, i32
  }
}

</mosaic_0001>

<bundles_post_ra>
// kernel: tpu_custom_call.1
= control target key start
LH: loop header
LB: loop body
LE: loop exit
PB: predicated region body
PF: predicated region fallthrough
CT: control target
= control target key end

     0   :  { %8 = vsyncpa [#allocation4], 0  ;;  %s4149_s0 = inlined_call_operand.vmem [shape: f32[2,18,18,4], index: 0, kind: input, shape index: {}]   ;;  %s4150_s1 = inlined_call_operand.vmem [shape: f32[2,18,18,4], index: 1, kind: input, shape index: {}]   ;;  %s4151_s2 = inlined_call_operand.vmem [shape: f32[9,4,128], index: 2, kind: input, shape index: {}]   ;;  %s4152_s3 = inlined_call_operand.hbm [shape: f32[2,256,128], index: 3, kind: output, shape index: {}]  }
   0x1   :  { %10 = vsyncpa [#allocation4 + $0x1], 0  ;;  %s3369_s12 = smov 0   ;;  %s3371_s13 = smov 0  }
   0x2   :  { %s3373_s14 = smov 0   ;;  %s3375_s15 = smov 0  }
   0x3   :  { %s3377_s16 = smov 0   ;;  %s3379_s17 = smov 0  }
   0x4   :  { %s3381_s18 = smov 0   ;;  %s3383_s19 = smov 0  }
   0x5 LB: > { %s2468_s20 = sadd.s32 4294967295, %s3344_s19   ;;  %s2469_s21 = sadd.s32 4294967294, %s3344_s19   ;;  %s3344_s19 = sphi %s3383_s19, %s16_s19   ;;  %s3340_s18 = sphi %s3381_s18, %s4162_s18   ;;  %s3336_s17 = sphi %s3379_s17, %s4161_s17   ;;  %s3332_s16 = sphi %s3377_s16, %s4160_s16   ;;  %s3328_s15 = sphi %s3375_s15, %s4159_s15   ;;  %s3324_s14 = sphi %s3373_s14, %s4158_s14   ;;  %s3320_s13 = sphi %s3371_s13, %s4157_s13   ;;  %s3316_s12 = sphi %s3369_s12, %s4156_s12  }
   0x6   : > { %s25_s22 = sadd.s32 1, %s3336_s17  ;;  %s28_s23 = sadd.s32 1, %s3340_s18 }
   0x7   : > { %p26_p0 = scmp.ge.s32.totalorder %s25_s22, 2  ;;  %p128_p1 = scmp.ne.s32.totalorder %s3324_s14, %s3320_s13 }
   0x8   : > { %p129_p2 = scmp.eq.s32.totalorder %s2468_s20, 3  ;;  %p134_p5 = scmp.ne.s32.totalorder %s3320_s13, %s3316_s12 }
   0x9   : > { %s4164_s22 = smov (%p26_p0, %s25_s22), 0  ;;  %s4166_s23 = smov (!%p26_p0, %s28_s23), %s3340_s18 }
   0xa   : > { %s114_s24 = ssub.s32 %s3336_s17, %s4164_s22  ;;  %p3420_p3 = por %p129_p2, %p128_p1 }
   0xb   : > { %p30_p4 = scmp.ge.s32.totalorder %s4166_s23, 2  ;;  %p135_p6 = scmp.eq.s32.totalorder %s2469_s21, 3 }
   0xc   : > { %p2474_p7 = scmp.ge.s32.totalorder %s3344_s19, 1  ;;  %p198_p9 = scmp.lt.s32.totalorder %s3344_s19, 5 }
   0xd   : > { %s4168_s23 = smov (%p30_p4, %s4166_s23), 0  ;;  %p3429_p8 = por %p135_p6, %p134_p5 }
   0xe   : > { %s113_s27 = ssub.s32 %s3340_s18, %s4168_s23  ;;  %s118_s28 = sadd.s32 1, %s3324_s14 }
   0xf   : > { %s115_s29 = sor.u32 %s114_s24, %s113_s27  ;;  %p199_p10 = pnand %p2474_p7, %p198_p9 }
  0x10   : > { %p116_p11 = scmp.eq.s32.totalorder %s115_s29, 0  ;;  %v311_v0 = vld [vmem:[%s4151_s2] sm:$0xf] (!%p199_p10)  ;;  %vm361_vm0 = vcmask (!%p199_p10), 1043456   ;;  %s3444_s6 = sshll.u32 (!%p199_p10), %s3328_s15, 3  ;;  %vm312_vm1 = vcmask (!%p199_p10), 31744  }
  0x11   : > { %202 = sbr.rel (%p199_p10) target bundleno = 408 (0x198), region = 32  ;;  %p250_p12 = scmp.lt.s32.totalorder (!%p199_p10), %s3332_s16, 1  ;;  %2810 = vmatprep.subr.msk.mxu1 (!%p199_p10), %vm361_vm0, %v311_v0  ;;  %v3452_v1 = vld [vmem:[%s4151_s2 + $0x10] sm:$0xf] (!%p199_p10)  ;;  %v2498_v2 = vld [vmem:[%s4151_s2 + $0x4] sm:$0xf] (!%p199_p10) }
  0x12   : > { %s3438_s30 = scalar_select %p116_p11, %s3324_s14, %s118_s28  }
  0x13   : > { %p252_p13 = scmp.lt.s32.totalorder (!%p199_p10), %s3444_s6, 17  ;;  %2811 = vmatpush3.msk.msra.mxu1 (!%p199_p10), %vm361_vm0, %v311_v0  ;;  %2914 = vmatprep.subr.msk.mxu0 (!%p199_p10), %vm361_vm0, %v3452_v1  ;;  %v2570_v3 = vld [vmem:[%s4151_s2 + $0x14] sm:$0xf] (!%p199_p10)  ;;  %s2656_s5 = sadd.s32 (!%p199_p10), 8, %s3444_s6  ;;  %vm534_vm2 = vcmask (!%p199_p10), 1046528   ;;  %vm805_vm3 = vcmask (!%p199_p10), 1045504  }
  0x14   : > { %2915 = vmatpush3.msk.msra.mxu0 (!%p199_p10), %vm361_vm0, %v3452_v1  ;;  %2836 = vmatprep.subr.msk.mxu1 (!%p199_p10), %vm361_vm0, %v2498_v2  ;;  %v3500_v9 = vld [vmem:[%s4151_s2 + $0x8] sm:$0xf] (!%p199_p10)  ;;  %p3504_p0 = scmp.lt.s32.totalorder (!%p199_p10), %s2656_s5, 17  ;;  %v2588_v29 = vld [vmem:[%s4151_s2 + $0x18] sm:$0xf] (!%p199_p10)  ;;  %s3346_s20 = smov (!%p199_p10), [#allocation3]  }
  0x15   : > { %2940 = vmatprep.subr.msk.mxu0 (!%p199_p10), %vm361_vm0, %v2570_v3  ;;  %v3654_v53 = vld [vmem:[%s4151_s2 + $0x1c] sm:$0xf] (!%p199_p10) }
  0x18   : > { %s3459_s11 = scalar_select %p250_p12, %s3332_s16, 1 }
  0x19   : > { %s253_s24 = scalar_select %p252_p13, %s3444_s6, 17 }
  0x1a   : > { %s3175_s27 = smul.u32 54, %s3459_s11  ;;  %s4170_s5 = smov (!%p3504_p0, %s2656_s5), 17 }
  0x1b   : > { %s3174_s28 = smul.u32 3, %s253_s24  ;;  %s241_s24 = sand.u32 1, %s3320_s13  }
  0x1c   : > { %s3176_s6 = smul.u32 3, %s4170_s5  ;;  %s4097_s8 = scalar_lea.sflag [#allocation4], %s241_s24 }
  0x1d   : > { %s256_s29 = sadd.s32 %s3175_s27, %s3174_s28  ;;  %s2475_s28 = sshll.u32 %s241_s24, 7 }
  0x1e   : > { %s2477_s4 = sshll.u32 %s256_s29, 3  ;;  %s274_s29 = sadd.s32 %s3176_s6, %s3175_s27 }
  0x1f   : > { %s3478_s9 = scalar_lea.vmem %s4149_s0, %s2477_s4  ;;  %s2480_s11 = sshll.u32 %s274_s29, 3 }
  0x20   : > { %v3481_v4 = vld [vmem:[%s3478_s9] sm:$0xff]  ;;  %v3484_v5 = vld [vmem:[%s3478_s9 + $0x8] sm:$0xff]  ;;  %v3487_v6 = vld [vmem:[%s3478_s9 + $0x18] sm:$0xff]  ;;  %s3649_s5 = scalar_lea.vmem %s4150_s1, %s2480_s11  ;;  %s4067_s6 = scalar_lea.vmem [#allocation3], %s2475_s28 }
  0x21   : > { %2812 = vmatprep.mubr.msk.f32.mxu1 %vm312_vm1, %v3481_v4  ;;  %v3492_v7 = vld [vmem:[%s3478_s9 + $0x20] sm:$0xff]  ;;  %v3495_v8 = vld [vmem:[%s3478_s9 + $0x30] sm:$0xff]  ;;  %v540_v10 = vrot.slane %v3487_v6, 1  ;;  %v3513_v12 = vld [vmem:[%s3478_s9 + $0x28] sm:$0x3]  ;;  %v811_v39 = vrot.slane %v3487_v6, 2 }
  0x22   : > { %2813 = vmatmul.mubr.msk.f32.vlgmr.msra.gmra.mrb[0].mxu1 %vm312_vm1, %v3484_v5  ;;  %v541_v11 = vrot.slane %v3492_v7, 1  ;;  %v3516_v13 = vld [vmem:[%s3478_s9 + $0x38] sm:$0xff]  ;;  %v545_v14 = vrot.slane %v3495_v8, 1  ;;  %v543_v15 = vrot.slane %v3513_v12, 1  ;;  %v3525_v17 = vld [vmem:[%s3478_s9 + $0x40] sm:$0x3] }
  0x23   : > { %2815 = vmatprep.mubr.msk.f32.mxu1 %vm312_vm1, %v3487_v6  ;;  %2837 = vmatpush3.msk.msra.mxu1 %vm361_vm0, %v2498_v2  ;;  %v546_v16 = vrot.slane %v3516_v13, 1  ;;  %v3528_v18 = vld [vmem:[%s3478_s9 + $0x48] sm:$0xff]  ;;  %v548_v20 = vrot.slane %v3525_v17, 1  ;;  %v3535_v21 = vld [vmem:[%s3478_s9 + $0x50] sm:$0xff]  ;;  %v3539_v23 = vld [vmem:[%s3478_s9 + $0x58] sm:$0x3] }
  0x24   : > { %v3531_v19 = vsel %vm534_vm2, %v540_v10, %v541_v11  ;;  %v550_v22 = vrot.slane %v3528_v18, 1  ;;  %2862 = vmatprep.subr.msk.mxu1 %vm361_vm0, %v3500_v9  ;;  %v3546_v24 = vsel %vm534_vm2, %v541_v11, %v543_v15  ;;  %v551_v26 = vrot.slane %v3535_v21, 1  ;;  %v3553_v27 = vld [vmem:[%s3478_s9 + $0x60] sm:$0xff]  ;;  %v3556_v28 = vld [vmem:[%s3478_s9 + $0x68] sm:$0xff]  ;;  %v3584_v35 = vld [vmem:[%s3478_s9 + $0x70] sm:$0x3] }
  0x25   : > { %2916 = vmatprep.mubr.msk.f32.mxu0 %vm312_vm1, %v3531_v19  ;;  %v3549_v25 = vsel %vm534_vm2, %v545_v14, %v546_v16  ;;  %v3573_v30 = vsel %vm534_vm2, %v546_v16, %v548_v20  ;;  %v553_v31 = vrot.slane %v3539_v23, 1  ;;  %v555_v33 = vrot.slane %v3553_v27, 1  ;;  %v3622_v44 = vld [vmem:[%s3478_s9 + $0x78] sm:$0xff]  ;;  %v3638_v48 = vld [vmem:[%s3478_s9 + $0x80] sm:$0xff]  ;;  %v3657_v54 = vld [vmem:[%s3478_s9 + $0x90] sm:$0xff]  ;;  %s2643_s29 = sshll.u32 %s3328_s15, 4 }
  0x26   : > { %2917 = vmatmul.mubr.msk.f32.vlgmr.msra.gmra.mrb[0].mxu0 %vm312_vm1, %v3546_v24  ;;  %2816 = vmatmul.mubr.msk.f32.gmra.mrb[2].mxu1 %vm312_vm1, %v3492_v7  ;;  %v3579_v32 = vsel %vm534_vm2, %v550_v22, %v551_v26  ;;  %v556_v34 = vrot.slane %v3556_v28, 1  ;;  %v558_v37 = vrot.slane %v3584_v35, 1  ;;  %v812_v40 = vrot.slane %v3492_v7, 2  ;;  %v3660_v55 = vld [vmem:[%s3649_s5 + $0x20] sm:$0xff]  ;;  %v310_v56 = vld [vmem:[%s3649_s5 + $0x28] sm:$0x3] }
  0x27   : > { %2941 = vmatpush3.msk.msra.mxu0 %vm361_vm0, %v2570_v3  ;;  %2919 = vmatprep.mubr.msk.f32.mxu0 %vm312_vm1, %v3549_v25  ;;  %v3596_v36 = vsel %vm534_vm2, %v551_v26, %v553_v31  ;;  %v814_v41 = vrot.slane %v3513_v12, 2  ;;  %v816_v45 = vrot.slane %v3495_v8, 2  ;;  %v817_v46 = vrot.slane %v3516_v13, 2  ;;  %v3677_v61 = vld [vmem:[%s3478_s9 + $0x98] sm:$0xff]  ;;  %v3688_v3 = vld [vmem:[%s3478_s9 + $0xa8] sm:$0xff]  ;;  %v3718_v20 = vld [vmem:[%s3478_s9 + $0xb0] sm:$0xff] }
  0x28   : > { %2818 = vmatprep.mubr.msk.f32.mxu1 %vm312_vm1, %v3495_v8  ;;  %2966 = vmatprep.subr.msk.mxu0 %vm361_vm0, %v2588_v29  ;;  %v3600_v38 = vsel %vm534_vm2, %v555_v33, %v556_v34  ;;  %v3616_v42 = vsel %vm534_vm2, %v556_v34, %v558_v37  ;;  %v3619_v43 = vsel %vm805_vm3, %v811_v39, %v812_v40  ;;  %v819_v49 = vrot.slane %v3525_v17, 2  ;;  %v3692_v11 = vld [vmem:[%s3478_s9 + $0x10] sm:$0x3]  ;;  %v298_v34 = vld [vmem:[%s3478_s9 + $0x88] sm:$0x3]  ;;  %s2644_s11 = sshll.u32 %s3332_s16, 5 }
  0x29   : > { %v3635_v47 = vsel %vm805_vm3, %v812_v40, %v814_v41  ;;  %v3642_v50 = vsel %vm805_vm3, %v816_v45, %v817_v46  ;;  %v821_v51 = vrot.slane %v3528_v18, 2  ;;  %v822_v52 = vrot.slane %v3535_v21, 2  ;;  %s2359_s27 = sadd.s32 %s2644_s11, %s2643_s29  ;;  %s2362_s16 = sshll.u32 %s4067_s6, 4  ;;  %s4091_s16 = int_to_ptr.vmem [resolvable:$true] %s2362_s16 }
  0x2a   : > { %2920 = vmatmul.mubr.msk.f32.gmra.mrb[2].mxu0 %vm312_vm1, %v3573_v30  ;;  %2819 = vmatmul.mubr.msk.f32.gmra.mrb[4].mxu1 %vm312_vm1, %v3516_v13  ;;  %v535_v57 = vrot.slane %v3481_v4, 1  ;;  %v536_v58 = vrot.slane %v3484_v5, 1  ;;  %v1901_v59 = vrot.slane %v3660_v55, 1  ;;  %v3674_v60 = vsel %vm805_vm3, %v817_v46, %v819_v49  ;;  %v301_v46 = vld [vmem:[%s3478_s9 + $0xa0] sm:$0x3]  ;;  %s2645_s15 = sshll.u32 %s2359_s27, 7 }
  0x2b   : > { %2922 = vmatprep.mubr.msk.f32.mxu0 %vm312_vm1, %v3579_v32  ;;  %2821 = vmatprep.mubr.msk.f32.mxu1 %vm312_vm1, %v3528_v18  ;;  %v824_v62 = vrot.slane %v3539_v23, 2  ;;  %v826_v63 = vrot.slane %v3553_v27, 2  ;;  %v2108_v0 = vrot.slane %v3660_v55, 2  ;;  %v3685_v2 = vsel %vm805_vm3, %v821_v51, %v822_v52  ;;  %v3752_v49 = vld [vmem:[%s4151_s2 + $0xc] sm:$0xf]  ;;  %s4089_s7 = scalar_lea.hbm %s4152_s3, %s2645_s15  ;;  %s3250_s10 = scalar_lea.vmem %s4091_s16, 2048 }
  0x2c   : > { %v827_v10 = vrot.slane %v3556_v28, 2  ;;  %v1903_v12 = vrot.slane %v310_v56, 1  ;;  %v2110_v14 = vrot.slane %v310_v56, 2  ;;  %v829_v22 = vrot.slane %v3584_v35, 2  ;;  %p3251_p1 = scmp.ne.s32.totalorder %s4091_s16, %s3250_s10 }
  0x2d   : > { %v3715_v17 = vsel %vm805_vm3, %v822_v52, %v824_v62  ;;  %v538_v23 = vrot.slane %v3692_v11, 1  ;;  %v831_v31 = vrot.slane %v3622_v44, 2  ;;  %v832_v33 = vrot.slane %v3638_v48, 2  ;;  %v304_v62 = vld [vmem:[%s3478_s9 + $0xb8] sm:$0x3]  ;;  %s3254_s9 = sshll.u32 %s3346_s20, 4  ;;  %s3255_s9 = int_to_ptr.vmem [resolvable:$false] %s3254_s9 }
  0x2e   : > { %2923 = vmatmul.mubr.msk.f32.gmra.mrb[4].mxu0 %vm312_vm1, %v3596_v36  ;;  %2822 = vmatmul.mubr.msk.f32.gmra.mrb[6].mxu1 %vm312_vm1, %v3535_v21  ;;  %v3703_v15 = vsel %vm534_vm2, %v1901_v59, %v1903_v12  ;;  %v3708_v16 = vsel %vm805_vm3, %v2108_v0, %v2110_v14  ;;  %v3723_v26 = vsel %vm805_vm3, %v826_v63, %v827_v10  ;;  %v834_v39 = vrot.slane %v298_v34, 2  ;;  %v3770_v63 = vld [vmem:[%s3649_s5] sm:$0xff]  ;;  %p3252_p2 = pnand %p3251_p1, %p3420_p3  ;;  %s3256_s21 = scalar_lea.vmem %s3255_s9, 4096 }
  0x2f   : > { %2925 = vmatprep.mubr.msk.f32.mxu0 %vm312_vm1, %v3600_v38  ;;  %2824 = vmatprep.mubr.msk.f32.mxu1 %vm312_vm1, %v3553_v27  ;;  %v3737_v35 = vsel %vm805_vm3, %v827_v10, %v829_v22  ;;  %v539_v37 = vsel %vm534_vm2, %v536_v58, %v538_v23  ;;  %v3741_v40 = vsel %vm805_vm3, %v831_v31, %v832_v33  ;;  %v836_v41 = vrot.slane %v3657_v54, 2  ;;  %v3773_v10 = vld [vmem:[%s3649_s5 + $0x8] sm:$0xff]  ;;  %v3794_v23 = vld [vmem:[%s3649_s5 + $0x10] sm:$0x3]  ;;  %p3257_p5 = scmp.lt.s32.totalorder %s4091_s16, %s3255_s9  ;;  %p3258_p6 = scmp.lt.s32.totalorder %s3256_s21, %s3250_s10 }
  0x30   : > { %v837_v45 = vrot.slane %v3677_v61, 2  ;;  %v3759_v51 = vsel %vm805_vm3, %v832_v33, %v834_v39  ;;  %v839_v52 = vrot.slane %v301_v46, 2  ;;  %v1488_v14 = vrot.slane %v3770_v63, 2  ;;  %p3253_p4 = pneg %p3252_p2 }
  0x31   : > { %v1489_v22 = vrot.slane %v3773_v10, 2  ;;  %v560_v33 = vrot.slane %v3622_v44, 1  ;;  %p3259_p7 = por %p3258_p6, %p3257_p5 }
  0x32   : > { %2926 = vmatmul.mubr.msk.f32.gmra.mrb[6].mxu0 %vm312_vm1, %v3616_v42  ;;  %2825 = vmatmul.mubr.msk.f32.gmra.mrb[8].mxu1 %vm312_vm1, %v3556_v28  ;;  %v3764_v56 = vsel %vm805_vm3, %v836_v41, %v837_v45  ;;  %v563_v41 = vrot.slane %v298_v34, 1 }
  0x33   : > { %2942 = vmatprep.mubr.msk.f32.mxu0 %vm312_vm1, %v3619_v43  ;;  %2827 = vmatprep.mubr.msk.f32.mxu1 %vm312_vm1, %v3622_v44  ;;  %v3809_v31 = vsel %vm805_vm3, %v1488_v14, %v1489_v22  ;;  %v571_v14 = vrot.slane %v3718_v20, 1  ;;  %p3260_p9 = pnand %p3259_p7, %p3253_p4 }
  0x36   : > { %2943 = vmatmul.mubr.msk.f32.vlgmr.msra.gmra.mrb[0].mxu0 %vm312_vm1, %v3635_v47  ;;  %2828 = vmatmul.mubr.msk.f32.gmra.mrb[10].mxu1 %vm312_vm1, %v3638_v48 }
  0x37   : > { %2967 = vmatpush3.msk.msra.mxu0 %vm361_vm0, %v2588_v29  ;;  %2945 = vmatprep.mubr.msk.f32.mxu0 %vm312_vm1, %v3642_v50  ;;  %v537_v29 = vsel %vm534_vm2, %v535_v57, %v536_v58  ;;  %v841_v57 = vrot.slane %v3688_v3, 2  ;;  %v842_v58 = vrot.slane %v3718_v20, 2 }
  0x38   : > { %2830 = vmatprep.mubr.msk.f32.mxu1 %vm312_vm1, %v3657_v54  ;;  %2992 = vmatprep.subr.msk.mxu0 %vm361_vm0, %v3654_v53 }
  0x39   : > { %v3789_v12 = vsel %vm805_vm3, %v841_v57, %v842_v58  ;;  %v566_v57 = vrot.slane %v3677_v61, 1 }
  0x3a   : > { %2946 = vmatmul.mubr.msk.f32.gmra.mrb[2].mxu0 %vm312_vm1, %v3674_v60  ;;  %2831 = vmatmul.mubr.msk.f32.gmra.mrb[12].mxu1 %vm312_vm1, %v3677_v61 }
  0x3b   : > { %2948 = vmatprep.mubr.msk.f32.mxu0 %vm312_vm1, %v3685_v2  ;;  %2833 = vmatprep.mubr.msk.f32.mxu1 %vm312_vm1, %v3688_v3 }
  0x3e   : > { %2949 = vmatmul.mubr.msk.f32.gmra.mrb[4].mxu0 %vm312_vm1, %v3715_v17  ;;  %2834 = vmatmul.mubr.msk.f32.gmra.mrb[14].mxu1 %vm312_vm1, %v3718_v20 }
  0x3f   : > { %2951 = vmatprep.mubr.msk.f32.mxu0 %vm312_vm1, %v3723_v26  ;;  %2838 = vmatprep.mubr.msk.f32.mxu1 %vm312_vm1, %v537_v29  ;;  %v1491_v29 = vrot.slane %v3794_v23, 2 }
  0x41   : > { %v3822_v39 = vsel %vm805_vm3, %v1489_v22, %v1491_v29  ;;  %v2624_v29 = vld [vmem:[%s4151_s2 + $0x20] sm:$0xf] }
  0x42   : > { %2952 = vmatmul.mubr.msk.f32.gmra.mrb[6].mxu0 %vm312_vm1, %v3737_v35  ;;  %2839 = vmatmul.mubr.msk.f32.vlgmr.msra.gmra.mrb[0].mxu1 %vm312_vm1, %v539_v37  ;;  %v561_v37 = vrot.slane %v3638_v48, 1 }
  0x43   : > { %2954 = vmatprep.mubr.msk.f32.mxu0 %vm312_vm1, %v3741_v40  ;;  %2841 = vmatprep.mubr.msk.f32.mxu1 %vm312_vm1, %v3531_v19  ;;  %v844_v19 = vrot.slane %v304_v62, 2 }
  0x44   : > { %2863 = vmatpush3.msk.msra.mxu1 %vm361_vm0, %v3500_v9  ;;  %v3786_v9 = vsel %vm805_vm3, %v837_v45, %v839_v52  ;;  %v3825_v45 = vsel %vm534_vm2, %v560_v33, %v561_v37  ;;  %v565_v52 = vrot.slane %v3657_v54, 1  ;;  %v3838_v34 = vsel %vm534_vm2, %v561_v37, %v563_v41 }
  0x45   : > { %2888 = vmatprep.subr.msk.mxu1 %vm361_vm0, %v3752_v49  ;;  %v573_v33 = vrot.slane %v304_v62, 1  ;;  %v806_v37 = vrot.slane %v3481_v4, 2  ;;  %v807_v41 = vrot.slane %v3484_v5, 2  ;;  %v809_v5 = vrot.slane %v3692_v11, 2 }
  0x46   : > { %2955 = vmatmul.mubr.msk.f32.gmra.mrb[8].mxu0 %vm312_vm1, %v3759_v51  ;;  %2842 = vmatmul.mubr.msk.f32.gmra.mrb[2].mxu1 %vm312_vm1, %v3546_v24  ;;  %v3805_v24 = vsel %vm805_vm3, %v842_v58, %v844_v19  ;;  %v568_v58 = vrot.slane %v301_v46, 1  ;;  %v570_v19 = vrot.slane %v3688_v3, 1  ;;  %v3843_v22 = vsel %vm534_vm2, %v565_v52, %v566_v57 }
  0x47   : > { %2957 = vmatprep.mubr.msk.f32.mxu0 %vm312_vm1, %v3764_v56  ;;  %2844 = vmatprep.mubr.msk.f32.mxu1 %vm312_vm1, %v3549_v25  ;;  %v3876_v4 = vsel %vm534_vm2, %v571_v14, %v573_v33  ;;  %v810_v62 = vsel %vm805_vm3, %v807_v41, %v809_v5 }
  0x48   : > { %v3857_v46 = vsel %vm534_vm2, %v566_v57, %v568_v58  ;;  %v3864_v52 = vsel %vm534_vm2, %v570_v19, %v571_v14 }
  0x4a   : > { %2958 = vmatmul.mubr.msk.f32.gmra.mrb[10].mxu0 %vm312_vm1, %v3786_v9  ;;  %2845 = vmatmul.mubr.msk.f32.gmra.mrb[4].mxu1 %vm312_vm1, %v3573_v30 }
  0x4b   : > { %2960 = vmatprep.mubr.msk.f32.mxu0 %vm312_vm1, %v3789_v12  ;;  %2847 = vmatprep.mubr.msk.f32.mxu1 %vm312_vm1, %v3579_v32 }
  0x4e   : > { %2961 = vmatmul.mubr.msk.f32.gmra.mrb[12].mxu0 %vm312_vm1, %v3805_v24  ;;  %2848 = vmatmul.mubr.msk.f32.gmra.mrb[6].mxu1 %vm312_vm1, %v3596_v36 }
  0x4f   : > { %2963 = vmatprep.mubr.msk.f32.mxu0 %vm312_vm1, %v3809_v31  ;;  %2850 = vmatprep.mubr.msk.f32.mxu1 %vm312_vm1, %v3600_v38 }
  0x52   : > { %2964 = vmatmul.mubr.msk.f32.gmra.mrb[14].mxu0 %vm312_vm1, %v3822_v39  ;;  %2851 = vmatmul.mubr.msk.f32.gmra.mrb[8].mxu1 %vm312_vm1, %v3616_v42 }
  0x53   : > { %2968 = vmatprep.mubr.msk.f32.mxu0 %vm312_vm1, %v3495_v8  ;;  %2853 = vmatprep.mubr.msk.f32.mxu1 %vm312_vm1, %v3825_v45 }
  0x56   : > { %2969 = vmatmul.mubr.msk.f32.vlgmr.msra.gmra.mrb[0].mxu0 %vm312_vm1, %v3516_v13  ;;  %2854 = vmatmul.mubr.msk.f32.gmra.mrb[10].mxu1 %vm312_vm1, %v3838_v34 }
  0x57   : > { %2993 = vmatpush3.msk.msra.mxu0 %vm361_vm0, %v3654_v53  ;;  %2971 = vmatprep.mubr.msk.f32.mxu0 %vm312_vm1, %v3528_v18  ;;  %v808_v53 = vsel %vm805_vm3, %v806_v37, %v807_v41 }
  0x58   : > { %2856 = vmatprep.mubr.msk.f32.mxu1 %vm312_vm1, %v3843_v22  ;;  %3018 = vmatprep.subr.msk.mxu0 %vm361_vm0, %v2624_v29 }
  0x5a   : > { %2972 = vmatmul.mubr.msk.f32.gmra.mrb[2].mxu0 %vm312_vm1, %v3535_v21  ;;  %2857 = vmatmul.mubr.msk.f32.gmra.mrb[12].mxu1 %vm312_vm1, %v3857_v46 }
  0x5b   : > { %2974 = vmatprep.mubr.msk.f32.mxu0 %vm312_vm1, %v3553_v27  ;;  %2859 = vmatprep.mubr.msk.f32.mxu1 %vm312_vm1, %v3864_v52 }
  0x5e   : > { %2975 = vmatmul.mubr.msk.f32.gmra.mrb[4].mxu0 %vm312_vm1, %v3556_v28  ;;  %2860 = vmatmul.mubr.msk.f32.gmra.mrb[14].mxu1 %vm312_vm1, %v3876_v4 }
  0x5f   : > { %2977 = vmatprep.mubr.msk.f32.mxu0 %vm312_vm1, %v3622_v44  ;;  %2864 = vmatprep.mubr.msk.f32.mxu1 %vm312_vm1, %v808_v53 }
  0x62   : > { %2978 = vmatmul.mubr.msk.f32.gmra.mrb[6].mxu0 %vm312_vm1, %v3638_v48  ;;  %2865 = vmatmul.mubr.msk.f32.vlgmr.msra.gmra.mrb[0].mxu1 %vm312_vm1, %v810_v62 }
  0x63   : > { %2980 = vmatprep.mubr.msk.f32.mxu0 %vm312_vm1, %v3657_v54  ;;  %2867 = vmatprep.mubr.msk.f32.mxu1 %vm312_vm1, %v3619_v43  ;;  %v3916_v43 = vld [vmem:[%s3649_s5 + $0x18] sm:$0xff] }
  0x64   : > { %2889 = vmatpush3.msk.msra.mxu1 %vm361_vm0, %v3752_v49 }
  0x65   : > { %3044 = vmatprep.subr.msk.mxu1 %vm361_vm0, %v3452_v1 }
  0x66   : > { %2981 = vmatmul.mubr.msk.f32.gmra.mrb[8].mxu0 %vm312_vm1, %v3677_v61  ;;  %2868 = vmatmul.mubr.msk.f32.gmra.mrb[2].mxu1 %vm312_vm1, %v3635_v47 }
  0x67   : > { %2983 = vmatprep.mubr.msk.f32.mxu0 %vm312_vm1, %v3688_v3  ;;  %2870 = vmatprep.mubr.msk.f32.mxu1 %vm312_vm1, %v3642_v50 }
  0x6a   : > { %2984 = vmatmul.mubr.msk.f32.gmra.mrb[10].mxu0 %vm312_vm1, %v3718_v20  ;;  %2871 = vmatmul.mubr.msk.f32.gmra.mrb[4].mxu1 %vm312_vm1, %v3674_v60 }
  0x6b   : > { %2986 = vmatprep.mubr.msk.f32.mxu0 %vm312_vm1, %v3770_v63  ;;  %2873 = vmatprep.mubr.msk.f32.mxu1 %vm312_vm1, %v3685_v2 }
  0x6e   : > { %2987 = vmatmul.mubr.msk.f32.gmra.mrb[12].mxu0 %vm312_vm1, %v3773_v10  ;;  %2874 = vmatmul.mubr.msk.f32.gmra.mrb[6].mxu1 %vm312_vm1, %v3715_v17 }
  0x6f   : > { %2989 = vmatprep.mubr.msk.f32.mxu0 %vm312_vm1, %v3916_v43  ;;  %2876 = vmatprep.mubr.msk.f32.mxu1 %vm312_vm1, %v3723_v26 }
  0x72   : > { %2990 = vmatmul.mubr.msk.f32.gmra.mrb[14].mxu0 %vm312_vm1, %v3660_v55  ;;  %2877 = vmatmul.mubr.msk.f32.gmra.mrb[8].mxu1 %vm312_vm1, %v3737_v35 }
  0x73   : > { %2994 = vmatprep.mubr.msk.f32.mxu0 %vm312_vm1, %v3549_v25  ;;  %2879 = vmatprep.mubr.msk.f32.mxu1 %vm312_vm1, %v3741_v40  ;;  %v1281_v25 = vrot.slane %v3770_v63, 1 }
  0x76   : > { %2995 = vmatmul.mubr.msk.f32.vlgmr.msra.gmra.mrb[0].mxu0 %vm312_vm1, %v3573_v30  ;;  %2880 = vmatmul.mubr.msk.f32.gmra.mrb[10].mxu1 %vm312_vm1, %v3759_v51  ;;  %v1282_v30 = vrot.slane %v3773_v10, 1 }
  0x77   : > { %3019 = vmatpush3.msk.msra.mxu0 %vm361_vm0, %v2624_v29  ;;  %2997 = vmatprep.mubr.msk.f32.mxu0 %vm312_vm1, %v3579_v32 }
  0x78   : > { %2882 = vmatprep.mubr.msk.f32.mxu1 %vm312_vm1, %v3764_v56 }
  0x7a   : > { %2998 = vmatmul.mubr.msk.f32.gmra.mrb[2].mxu0 %vm312_vm1, %v3596_v36  ;;  %2883 = vmatmul.mubr.msk.f32.gmra.mrb[12].mxu1 %vm312_vm1, %v3786_v9 }
  0x7b   : > { %3000 = vmatprep.mubr.msk.f32.mxu0 %vm312_vm1, %v3600_v38  ;;  %2885 = vmatprep.mubr.msk.f32.mxu1 %vm312_vm1, %v3789_v12 }
  0x7e   : > { %3001 = vmatmul.mubr.msk.f32.gmra.mrb[4].mxu0 %vm312_vm1, %v3616_v42  ;;  %2886 = vmatmul.mubr.msk.f32.gmra.mrb[14].mxu1 %vm312_vm1, %v3805_v24 }
  0x7f   : > { %3003 = vmatprep.mubr.msk.f32.mxu0 %vm312_vm1, %v3825_v45  ;;  %2890 = vmatprep.mubr.msk.f32.mxu1 %vm312_vm1, %v3487_v6  ;;  %v1284_v6 = vrot.slane %v3794_v23, 1 }
  0x82   : > { %3004 = vmatmul.mubr.msk.f32.gmra.mrb[6].mxu0 %vm312_vm1, %v3838_v34  ;;  %2891 = vmatmul.mubr.msk.f32.vlgmr.msra.gmra.mrb[0].mxu1 %vm312_vm1, %v3492_v7  ;;  %v1283_v7 = vsel %vm534_vm2, %v1281_v25, %v1282_v30 }
  0x83   : > { %3006 = vmatprep.mubr.msk.f32.mxu0 %vm312_vm1, %v3843_v22  ;;  %2893 = vmatprep.mubr.msk.f32.mxu1 %vm312_vm1, %v3495_v8  ;;  %v1285_v8 = vsel %vm534_vm2, %v1282_v30, %v1284_v6 }
  0x84   : > { %3045 = vmatpush3.msk.msra.mxu1 %vm361_vm0, %v3452_v1  ;;  %v1900_v1 = vrot.slane %v3916_v43, 1 }
  0x86   : > { %3007 = vmatmul.mubr.msk.f32.gmra.mrb[8].mxu0 %vm312_vm1, %v3857_v46  ;;  %2894 = vmatmul.mubr.msk.f32.gmra.mrb[2].mxu1 %vm312_vm1, %v3516_v13  ;;  %v1902_v13 = vsel %vm534_vm2, %v1900_v1, %v1901_v59 }
  0x87   : > { %3009 = vmatprep.mubr.msk.f32.mxu0 %vm312_vm1, %v3864_v52  ;;  %2896 = vmatprep.mubr.msk.f32.mxu1 %vm312_vm1, %v3528_v18  ;;  %v2107_v18 = vrot.slane %v3916_v43, 2 }
  0x8a   : > { %3010 = vmatmul.mubr.msk.f32.gmra.mrb[10].mxu0 %vm312_vm1, %v3876_v4  ;;  %2897 = vmatmul.mubr.msk.f32.gmra.mrb[4].mxu1 %vm312_vm1, %v3535_v21  ;;  %v2109_v21 = vsel %vm805_vm3, %v2107_v18, %v2108_v0 }
  0x8b   : > { %3012 = vmatprep.mubr.msk.f32.mxu0 %vm312_vm1, %v1283_v7  ;;  %2899 = vmatprep.mubr.msk.f32.mxu1 %vm312_vm1, %v3553_v27 }
  0x8e   : > { %3013 = vmatmul.mubr.msk.f32.gmra.mrb[12].mxu0 %vm312_vm1, %v1285_v8  ;;  %2900 = vmatmul.mubr.msk.f32.gmra.mrb[6].mxu1 %vm312_vm1, %v3556_v28 }
  0x8f   : > { %3015 = vmatprep.mubr.msk.f32.mxu0 %vm312_vm1, %v1902_v13  ;;  %2902 = vmatprep.mubr.msk.f32.mxu1 %vm312_vm1, %v3622_v44 }
  0x92   : > { %3016 = vmatmul.mubr.msk.f32.gmra.mrb[14].mxu0 %vm312_vm1, %v3703_v15  ;;  %2903 = vmatmul.mubr.msk.f32.gmra.mrb[8].mxu1 %vm312_vm1, %v3638_v48 }
  0x93   : > { %3020 = vmatprep.mubr.msk.f32.mxu0 %vm312_vm1, %v3642_v50  ;;  %2905 = vmatprep.mubr.msk.f32.mxu1 %vm312_vm1, %v3657_v54 }
  0x96   : > { %3021 = vmatmul.mubr.msk.f32.vlgmr.msra.gmra.mrb[0].mxu0 %vm312_vm1, %v3674_v60  ;;  %2906 = vmatmul.mubr.msk.f32.gmra.mrb[10].mxu1 %vm312_vm1, %v3677_v61 }
  0x97   : > { %3023 = vmatprep.mubr.msk.f32.mxu0 %vm312_vm1, %v3685_v2  ;;  %2908 = vmatprep.mubr.msk.f32.mxu1 %vm312_vm1, %v3688_v3 }
  0x9a   : > { %3024 = vmatmul.mubr.msk.f32.gmra.mrb[2].mxu0 %vm312_vm1, %v3715_v17  ;;  %2909 = vmatmul.mubr.msk.f32.gmra.mrb[12].mxu1 %vm312_vm1, %v3718_v20 }
  0x9b   : > { %3026 = vmatprep.mubr.msk.f32.mxu0 %vm312_vm1, %v3723_v26  ;;  %2911 = vmatprep.mubr.msk.f32.mxu1 %vm312_vm1, %v3770_v63 }
  0x9e   : > { %3027 = vmatmul.mubr.msk.f32.gmra.mrb[4].mxu0 %vm312_vm1, %v3737_v35  ;;  %2912 = vmatmul.mubr.msk.f32.gmra.mrb[14].mxu1 %vm312_vm1, %v3773_v10 }
  0x9f   : > { %3029 = vmatprep.mubr.msk.f32.mxu0 %vm312_vm1, %v3741_v40  ;;  %2928 = vmatprep.mubr.msk.f32.mxu1 %vm312_vm1, %v3825_v45 }
  0xa2   : > { %3030 = vmatmul.mubr.msk.f32.gmra.mrb[6].mxu0 %vm312_vm1, %v3759_v51  ;;  %2929 = vmatmul.mubr.msk.f32.vlgmr.msra.gmra.mrb[8].mxu1 %vm312_vm1, %v3838_v34 }
  0xa3   : > { %3032 = vmatprep.mubr.msk.f32.mxu0 %vm312_vm1, %v3764_v56  ;;  %2931 = vmatprep.mubr.msk.f32.mxu1 %vm312_vm1, %v3843_v22 }
  0xa6   : > { %3033 = vmatmul.mubr.msk.f32.gmra.mrb[8].mxu0 %vm312_vm1, %v3786_v9  ;;  %2932 = vmatmul.mubr.msk.f32.gmra.mrb[10].mxu1 %vm312_vm1, %v3857_v46 }
  0xa7   : > { %3035 = vmatprep.mubr.msk.f32.mxu0 %vm312_vm1, %v3789_v12  ;;  %2934 = vmatprep.mubr.msk.f32.mxu1 %vm312_vm1, %v3864_v52 }
  0xaa   : > { %3036 = vmatmul.mubr.msk.f32.gmra.mrb[10].mxu0 %vm312_vm1, %v3805_v24  ;;  %2935 = vmatmul.mubr.msk.f32.gmra.mrb[12].mxu1 %vm312_vm1, %v3876_v4 }
  0xab   : > { %3038 = vmatprep.mubr.msk.f32.mxu0 %vm312_vm1, %v3809_v31  ;;  %2937 = vmatprep.mubr.msk.f32.mxu1 %vm312_vm1, %v1283_v7 }
  0xae   : > { %3039 = vmatmul.mubr.msk.f32.gmra.mrb[12].mxu0 %vm312_vm1, %v3822_v39  ;;  %2938 = vmatmul.mubr.msk.f32.gmra.mrb[14].mxu1 %vm312_vm1, %v1285_v8 }
  0xaf   : > { %3041 = vmatprep.mubr.msk.f32.mxu0 %vm312_vm1, %v2109_v21 }
  0xb2   : > { %3042 = vmatmul.mubr.msk.f32.gmra.mrb[14].mxu0 %vm312_vm1, %v3708_v16 }
 0x155   : > { %v2892_v27 = vpop.f32.mrb[0].mxu1 }
 0x156   : > { %v1153_v28 = vpop.f32.mrb[1].mxu1 }
 0x159   : > { %v2895_v32 = vpop.f32.mrb[2].mxu1 }
 0x15a   : > { %v1163_v36 = vpop.f32.mrb[3].mxu1 }
 0x15d   : > { %v2898_v38 = vpop.f32.mrb[4].mxu1 }
 0x15e   : > { %v1173_v42 = vpop.f32.mrb[5].mxu1 }
 0x161   : > { %v2901_v44 = vpop.f32.mrb[6].mxu1 }
 0x162   : > { %v1183_v47 = vpop.f32.mrb[7].mxu1 }
 0x169   : > { %v3022_v48 = vpop.f32.mrb[0].mxu0 }
 0x16a   : > { %v3046_v50 = vadd.f32 %v3022_v48, %v2892_v27  ;;  %v2187_v54 = vpop.f32.mrb[1].mxu0 }
 0x16b   : > { %v3047_v55 = vadd.f32 %v2187_v54, %v1153_v28 }
 0x16c   : > { %2331 = vst [vmem:[%s4067_s6 + $0x8] sm:$0xff] %v3046_v50 }
 0x16d   : > { %2330 = vst [vmem:[%s4067_s6] sm:$0xff] %v3047_v55  ;;  %v3025_v59 = vpop.f32.mrb[2].mxu0 }
 0x16e   : > { %v3048_v60 = vadd.f32 %v3025_v59, %v2895_v32  ;;  %v2197_v61 = vpop.f32.mrb[3].mxu0 }
 0x16f   : > { %v3049_v0 = vadd.f32 %v2197_v61, %v1163_v36 }
 0x170   : > { %2333 = vst [vmem:[%s4067_s6 + $0x18] sm:$0xff] %v3048_v60 }
 0x171   : > { %2332 = vst [vmem:[%s4067_s6 + $0x10] sm:$0xff] %v3049_v0  ;;  %v3028_v2 = vpop.f32.mrb[4].mxu0 }
 0x172   : > { %v3050_v3 = vadd.f32 %v3028_v2, %v2898_v38  ;;  %v2207_v11 = vpop.f32.mrb[5].mxu0 }
 0x173   : > { %v3051_v15 = vadd.f32 %v2207_v11, %v1173_v42 }
 0x174   : > { %2335 = vst [vmem:[%s4067_s6 + $0x28] sm:$0xff] %v3050_v3 }
 0x175   : > { %2334 = vst [vmem:[%s4067_s6 + $0x20] sm:$0xff] %v3051_v15  ;;  %v3031_v16 = vpop.f32.mrb[6].mxu0  ;;  %v2930_v17 = vpop.f32.mrb[8].mxu1 }
 0x176   : > { %v3052_v20 = vadd.f32 %v3031_v16, %v2901_v44  ;;  %v2217_v26 = vpop.f32.mrb[7].mxu0  ;;  %v1401_v35 = vpop.f32.mrb[9].mxu1 }
 0x177   : > { %v3053_v40 = vadd.f32 %v2217_v26, %v1183_v47 }
 0x178   : > { %2337 = vst [vmem:[%s4067_s6 + $0x38] sm:$0xff] %v3052_v20 }
 0x179   : > { %2336 = vst [vmem:[%s4067_s6 + $0x30] sm:$0xff] %v3053_v40  ;;  %v3034_v49 = vpop.f32.mrb[8].mxu0  ;;  %v2933_v51 = vpop.f32.mrb[10].mxu1 }
 0x17a   : > { %v3054_v56 = vadd.f32 %v3034_v49, %v2930_v17  ;;  %v2227_v63 = vpop.f32.mrb[9].mxu0  ;;  %v1411_v10 = vpop.f32.mrb[11].mxu1 }
 0x17b   : > { %v3055_v9 = vadd.f32 %v2227_v63, %v1401_v35 }
 0x17c   : > { %2339 = vst [vmem:[%s4067_s6 + $0x48] sm:$0xff] %v3054_v56 }
 0x17d   : > { %2338 = vst [vmem:[%s4067_s6 + $0x40] sm:$0xff] %v3055_v9  ;;  %v3037_v12 = vpop.f32.mrb[10].mxu0  ;;  %v2936_v23 = vpop.f32.mrb[12].mxu1 }
 0x17e   : > { %v3056_v24 = vadd.f32 %v3037_v12, %v2933_v51  ;;  %v2237_v31 = vpop.f32.mrb[11].mxu0  ;;  %v1421_v39 = vpop.f32.mrb[13].mxu1 }
 0x17f   : > { %v3057_v45 = vadd.f32 %v2237_v31, %v1411_v10 }
 0x180   : > { %2341 = vst [vmem:[%s4067_s6 + $0x58] sm:$0xff] %v3056_v24 }
 0x181   : > { %2340 = vst [vmem:[%s4067_s6 + $0x50] sm:$0xff] %v3057_v45  ;;  %v3040_v57 = vpop.f32.mrb[12].mxu0  ;;  %v2939_v34 = vpop.f32.mrb[14].mxu1 }
 0x182   : > { %v3058_v58 = vadd.f32 %v3040_v57, %v2936_v23  ;;  %v2247_v19 = vpop.f32.mrb[13].mxu0  ;;  %v1431_v14 = vpop.f32.mrb[15].mxu1 }
 0x183   : > { %v3059_v22 = vadd.f32 %v2247_v19, %v1421_v39 }
 0x184   : > { %2343 = vst [vmem:[%s4067_s6 + $0x68] sm:$0xff] %v3058_v58 }
 0x185   : > { %2342 = vst [vmem:[%s4067_s6 + $0x60] sm:$0xff] %v3059_v22  ;;  %v3043_v29 = vpop.f32.mrb[14].mxu0 }
 0x186   : > { %v3060_v46 = vadd.f32 %v3043_v29, %v2939_v34  ;;  %v2257_v33 = vpop.f32.mrb[15].mxu0 }
 0x187   : > { %v3061_v37 = vadd.f32 %v2257_v33, %v1431_v14 }
 0x188   : > { %2345 = vst [vmem:[%s4067_s6 + $0x78] sm:$0xff] %v3060_v46 }
 0x189   : > { %2344 = vst [vmem:[%s4067_s6 + $0x70] sm:$0xff] %v3061_v37 }
 0x18a   : > { %3263 = shalt.err (!%p3260_p9)
}
 0x18b   : > { %s3264_s24 = scalar_lea.hbm %s4089_s7, 2048  ;;  %s3268_s29 = scalar_lea.hbm %s4152_s3, 8192 }
 0x18c   : > { %p3265_p10 = scmp.ne.s32.totalorder %s4089_s7, %s3264_s24  ;;  %p3269_p13 = scmp.lt.u32.totalorder %s4089_s7, %s4152_s3 }
 0x18d   : > { %p3270_p0 = scmp.lt.u32.totalorder %s3268_s29, %s3264_s24  ;;  %p3272_p2 = scmp.lt.u32.totalorder %s3264_s24, %s4089_s7 }
 0x18e   : > { %p3266_p11 = pnand %p3265_p10, %p3420_p3 }
 0x18f   : > { %p3271_p1 = por %p3270_p0, %p3269_p13 }
 0x190   : > { %p3267_p12 = pneg %p3266_p11 }
 0x191   : > { %p3273_p4 = por %p3272_p2, %p3271_p1 }
 0x193   : > { %p3274_p5 = pnand %p3273_p4, %p3267_p12 }
 0x195   : > { %3277 = shalt.err (!%p3274_p5)
}
 0x196   : > { %s3347_s15 = smov 128   ;;  %s3348_s4 = smov 8  }
 0x197   : > { %3177 = dma.vmem_to_hbm [thread:$0]  (%p3420_p3), %s4091_s16, 2048, %s4089_s7, %s4097_s8, %s3347_s15, %s3347_s15, %s3348_s4  }
 0x198 PF: > { %p3183_p6 = scmp.ge.s32.totalorder %s3344_s19, 2  ;;  %s2377_s5 = sand.u32 1, %s3316_s12  }
 0x199   : > { %s2378_s10 = scalar_lea.sflag [#allocation4], %s2377_s5 }
 0x19a   : > { %p3180_p7 = pnand %p3183_p6, %p3429_p8 }
 0x19c   : > { %3311 = dma.done.wait (!%p3180_p7), %s2378_s10, 2048  }
 0x19d   : > { %3313 = vsyncadd (!%p3180_p7), %s2378_s10, 4294965248  ;;  %s16_s19 = sadd.s32 1, %s3344_s19   ;;  %s4156_s12 = smov %s3320_s13 }
 0x19e   : > { %p13_p9 = scmp.ge.s32.totalorder %s16_s19, 6   ;;  %s4157_s13 = smov %s3324_s14 }
 0x19f   : > { %s4158_s14 = smov %s3438_s30  ;;  %s4159_s15 = smov %s3336_s17 }
 0x1a0   : > { %s4160_s16 = smov %s3340_s18  ;;  %s4161_s17 = smov %s4164_s22 }
 0x1a1   : > { %s4162_s18 = smov %s4168_s23  ;;  %15 = sbr.rel (!%p13_p9) target bundleno = 5 (0x5), region = 78 }
 0x1a8   :  { %2383 = vsyncpa [#allocation4], 1 }
 0x1a9   :  { %2385 = vsyncpa [#allocation4 + $0x1], 1 }

</bundles_post_ra>
